<compile_context>
chip_gen: v6e
topology: v6e:2x2x1
jax: 0.10.0
libtpu: 0.0.40
codegen_flags: <defaults>
</compile_context>

<pallas_src>
import functools

import jax
import jax.numpy as jnp
from jax import lax
from jax.experimental import pallas as pl
from jax.experimental.pallas import tpu as pltpu


TEMPERATURE = 0.1  # stands in for args.temperature in the original script
_MIB = 1 << 20


def _round_up(n, m):
    return ((n + m - 1) // m) * m


def _pick_block_m(b_pad, cap):
    for bm in (512, 256, 128):
        if bm <= cap and b_pad % bm == 0:
            return bm
    return 128  # unreachable: b_pad is always a multiple of 128


def _resident_spec(shape, index_map):
    # Constant-index operand: it is DMA'd once, so double-buffering it only wastes VMEM.
    # Ask the pipeliner for a single buffer; fall back if this JAX has no pipeline_mode.
    try:
        return pl.BlockSpec(shape, index_map, pipeline_mode=pl.Buffered(1))
    except (TypeError, AttributeError):
        return pl.BlockSpec(shape, index_map)


def _cparams(footprint_bytes):
    # Raise the scoped-VMEM default (32 MiB) up to the real footprint + headroom, but stay
    # <= 64 MiB so the limit is legal on v7x as well as v5e/v6e (128 MiB physical).
    limit = int(min(max(footprint_bytes + 8 * _MIB, 32 * _MIB), 64 * _MIB))
    return pltpu.CompilerParams(dimension_semantics=("parallel",),
                                vmem_limit_bytes=limit)


# --------------------------- kernel 1: row L2 normalize ---------------------------
def _l2_normalize_kernel(x_ref, z_ref):
    x = x_ref[...]                                                 # (bm, d_pad) f32
    # 1/max(||x||, 1e-12) as an rsqrt + VPU multiply (no per-element EUP divides).
    inv = lax.rsqrt(jnp.maximum(jnp.sum(x * x, axis=-1, keepdims=True), 1e-24))
    z_ref[...] = (x * inv).astype(z_ref.dtype)                     # bf16 out


# ------------------- kernel 2: R = row-normalize(z @ z.T) --------------------------
def _row_norm_gram_kernel(block_m, z_ref, r_ref):
    i = pl.program_id(0)
    r0 = pl.multiple_of(i * block_m, block_m)
    z_blk = z_ref[pl.ds(r0, block_m), :]                           # slice of resident z
    g = jnp.einsum('md,nd->mn', z_blk, z_ref[...],
                   preferred_element_type=jnp.float32)             # (bm, b_pad) f32
    # CosineSimilarity row-normalization of the "logits"; the /temperature scale cancels
    # under this normalization, so it is dropped (mathematical no-op).
    inv = lax.rsqrt(jnp.maximum(jnp.sum(g * g, axis=-1, keepdims=True), 1e-24))
    r_ref[...] = (g * inv).astype(r_ref.dtype)                     # bf16 out


# ----------------- kernel 3: supervised NT-Xent partial reductions -----------------
def _ntxent_partial_kernel(n_valid, block_m, inv_t, needs_pad_mask,
                           r_ref, lab_col_ref, lab_row_ref, out_ref):
    i = pl.program_id(0)
    b_pad = r_ref.shape[0]
    r0 = pl.multiple_of(i * block_m, block_m)

    r_blk = r_ref[pl.ds(r0, block_m), :]                           # slice of resident R
    s = jnp.einsum('mk,nk->mn', r_blk, r_ref[...],
                   preferred_element_type=jnp.float32) * inv_t     # (bm, b_pad) f32

    lab_a = lab_col_ref[pl.ds(r0, block_m), :]                     # (bm, 1)  int32 (resident)
    lab_b = lab_row_ref[...]                                       # (1, b_pad) int32 (resident)
    col = lax.broadcasted_iota(jnp.int32, (block_m, b_pad), 1)
    row = r0 + lax.broadcasted_iota(jnp.int32, (block_m, b_pad), 0)
    same = lab_a == lab_b
    not_diag = row != col
    if needs_pad_mask:                                             # static: only if B % 128 != 0
        valid = (row < n_valid) & (col < n_valid)
        pos_mask = same & not_diag & valid
        neg_mask = (~same) & valid
    else:
        pos_mask = same & not_diag
        neg_mask = ~same

    # Single-shift LSE: c = rowmax(s) (the diagonal s_ii = 1/T > 0 dominates padded zeros),
    # one exp, one log; no per-element max/divide and no second exp pass.
    c = jnp.max(s, axis=-1, keepdims=True)
    e = jnp.exp(s - c)
    z_neg = jnp.sum(jnp.where(neg_mask, e, 0.0), axis=-1, keepdims=True)
    # -log( e_ap / (e_ap + z_neg) ) = log(e_ap + z_neg) - (s_ap - c)
    pair_loss = jnp.log(e + z_neg) - (s - c)

    loss_sum = jnp.sum(jnp.where(pos_mask, pair_loss, 0.0))
    pos_cnt = jnp.sum(pos_mask.astype(jnp.float32))
    neg_cnt = jnp.sum(neg_mask.astype(jnp.float32))

    # lane-dense (8,128) partial tile: [loss_sum, pos_cnt, neg_cnt, 0, ...] in sublane 0
    sub = lax.broadcasted_iota(jnp.int32, (8, 128), 0)
    lane = lax.broadcasted_iota(jnp.int32, (8, 128), 1)
    out_ref[...] = (jnp.where((sub == 0) & (lane == 0), loss_sum, 0.0)
                    + jnp.where((sub == 0) & (lane == 1), pos_cnt, 0.0)
                    + jnp.where((sub == 0) & (lane == 2), neg_cnt, 0.0))


# ------------------------------------ wrapper --------------------------------------
def supervised_contrastive_loss(feature_vectors, labels, temperature=TEMPERATURE):
    x = feature_vectors.astype(jnp.float32)
    b, d = x.shape
    labels = jnp.reshape(labels, (-1,)).astype(jnp.int32)          # torch.squeeze(labels)

    b_pad = _round_up(b, 128)
    d_pad = _round_up(d, 128)
    bm_norm = _pick_block_m(b_pad, 512)   # K1 / K2 row block (cheap f32 temps)
    bm_loss = _pick_block_m(b_pad, 256)   # K3 row block (many f32 temporaries -> smaller)
    n_norm = b_pad // bm_norm
    n_loss = b_pad // bm_loss
    inv_t = float(1.0 / temperature)
    needs_pad_mask = (b_pad != b)

    x_p = jnp.zeros((b_pad, d_pad), jnp.float32).at[:b, :d].set(x)
    lab_p = jnp.zeros((b_pad,), jnp.int32).at[:b].set(labels)
    lab_col = lab_p.reshape(b_pad, 1)
    lab_row = lab_p.reshape(1, b_pad)

    # K1: z = l2norm(x)  (bf16 in HBM)
    k1_fp = 2 * bm_norm * d_pad * 4 + 2 * bm_norm * d_pad * 2 + 2 * bm_norm * d_pad * 4
    z = pl.pallas_call(
        _l2_normalize_kernel,
        out_shape=jax.ShapeDtypeStruct((b_pad, d_pad), jnp.bfloat16),
        grid=(n_norm,),
        in_specs=[pl.BlockSpec((bm_norm, d_pad), lambda i: (i, 0))],
        out_specs=pl.BlockSpec((bm_norm, d_pad), lambda i: (i, 0)),
        compiler_params=_cparams(k1_fp),
    )(x_p)

    # K2: R = rownorm(z @ z.T)  (single resident z operand; row block sliced in-kernel)
    k2_fp = 2 * b_pad * d_pad * 2 + 2 * bm_norm * b_pad * 2 + 3 * bm_norm * b_pad * 4
    r = pl.pallas_call(
        functools.partial(_row_norm_gram_kernel, bm_norm),
        out_shape=jax.ShapeDtypeStruct((b_pad, b_pad), jnp.bfloat16),
        grid=(n_norm,),
        in_specs=[_resident_spec((b_pad, d_pad), lambda i: (0, 0))],
        out_specs=pl.BlockSpec((bm_norm, b_pad), lambda i: (i, 0)),
        compiler_params=_cparams(k2_fp),
    )(z)

    # K3: per-row-block supervised NT-Xent partial sums (R read from HBM exactly once)
    k3_fp = (2 * b_pad * b_pad * 2            # resident R (conservative: 2 buffers)
             + 6 * bm_loss * b_pad * 4        # live f32 elementwise temporaries
             + 2 * b_pad * 4 + 4 * 8 * 128 * 4)
    partials = pl.pallas_call(
        functools.partial(_ntxent_partial_kernel, b, bm_loss, inv_t, needs_pad_mask),
        out_shape=jax.ShapeDtypeStruct((n_loss * 8, 128), jnp.float32),
        grid=(n_loss,),
        in_specs=[_resident_spec((b_pad, b_pad), lambda i: (0, 0)),
                  _resident_spec((b_pad, 1), lambda i: (0, 0)),
                  _resident_spec((1, b_pad), lambda i: (0, 0))],
        out_specs=pl.BlockSpec((8, 128), lambda i: (i, 0)),
        compiler_params=_cparams(k3_fp),
        cost_estimate=pl.CostEstimate(
            flops=2 * b_pad * b_pad * b_pad,
            transcendentals=2 * b_pad * b_pad,
            bytes_accessed=b_pad * b_pad * 2 + 2 * b_pad * 4 + n_loss * 8 * 128 * 4),
    )(r, lab_col, lab_row)

    totals = jnp.sum(partials, axis=0)
    loss_sum, pos_cnt, neg_cnt = totals[0], totals[1], totals[2]
    have_pairs = (pos_cnt > 0) & (neg_cnt > 0)
    return jnp.where(have_pairs, loss_sum / jnp.maximum(pos_cnt, 1.0), 0.0)


# --------------------------- pure-JAX reference (same casts) -----------------------
def _reference_loss(x, labels, temperature):
    x = x.astype(jnp.float32)
    labels = jnp.reshape(labels, (-1,)).astype(jnp.int32)
    b = x.shape[0]
    inv_x = lax.rsqrt(jnp.maximum(jnp.sum(x * x, axis=-1, keepdims=True), 1e-24))
    z = (x * inv_x).astype(jnp.bfloat16)
    g = jnp.einsum('md,nd->mn', z, z, preferred_element_type=jnp.float32)
    inv_g = lax.rsqrt(jnp.maximum(jnp.sum(g * g, axis=-1, keepdims=True), 1e-24))
    r = (g * inv_g).astype(jnp.bfloat16)
    s = jnp.einsum('mk,nk->mn', r, r, preferred_element_type=jnp.float32) / temperature

    same = labels[:, None] == labels[None, :]
    eye = jnp.eye(b, dtype=bool)
    pos_mask = same & ~eye
    neg_mask = ~same

    c = jnp.max(s, axis=-1, keepdims=True)
    e = jnp.exp(s - c)
    z_neg = jnp.sum(jnp.where(neg_mask, e, 0.0), axis=-1, keepdims=True)
    pair_loss = jnp.log(e + z_neg) - (s - c)
    loss_sum = jnp.sum(jnp.where(pos_mask, pair_loss, 0.0))
    pos_cnt = jnp.sum(pos_mask.astype(jnp.float32))
    neg_cnt = jnp.sum(neg_mask.astype(jnp.float32))
    return jnp.where((pos_cnt > 0) & (neg_cnt > 0),
                     loss_sum / jnp.maximum(pos_cnt, 1.0), 0.0)


if __name__ == "__main__":
    key = jax.random.PRNGKey(0)
    k_x, k_l = jax.random.split(key)

    B, D, n_classes = 16, 64, 4
    x = jax.random.normal(k_x, (B, D), jnp.float32)
    labels = jax.random.randint(k_l, (B, 1), 0, n_classes, dtype=jnp.int32)

    loss_fn = jax.jit(lambda xx, ll: supervised_contrastive_loss(xx, ll, TEMPERATURE))
    loss = jax.block_until_ready(loss_fn(x, labels))

    ref = jax.block_until_ready(_reference_loss(x, labels, TEMPERATURE))

    assert loss.shape == ()
    assert bool(jnp.isfinite(loss))
    assert jnp.allclose(loss, ref, atol=2e-3, rtol=2e-3), (loss, ref)

    print("KERNEL_OK")
</pallas_src>

<mosaic_0001>
module attributes {stable_mosaic.version = 11 : i64} {
  func.func @_row_norm_gram_kernel(%arg0: i32, %arg1: memref<128x128xbf16, #tpu.memory_space<vmem>>, %arg2: memref<128x128xbf16, #tpu.memory_space<vmem>>) attributes {dimension_semantics = [#tpu.dimension_semantics<parallel>], iteration_bounds = array<i64: 1>, scalar_prefetch = 0 : i64, scratch_operands = 0 : i64, tpu.core_type = #tpu.core_type<tc>, window_params = [{pipeline_mode = #tpu.pipeline_mode<synchronous>, transform_indices = @transform_0, window_bounds = array<i64: 128, 128>}, {transform_indices = @transform_1, window_bounds = array<i64: 128, 128>}]} {
    %c128_i32 = arith.constant 128 : i32
    %0 = arith.muli %arg0, %c128_i32 : i32
    %1 = tpu.assume_multiple %0, 128 : i32
    %2 = arith.index_cast %1 : i32 to index
    %c0 = arith.constant 0 : index
    %3 = vector.load %arg1[%2, %c0] : memref<128x128xbf16, #tpu.memory_space<vmem>>, vector<128x128xbf16>
    %c0_0 = arith.constant 0 : index
    %c0_1 = arith.constant 0 : index
    %4 = vector.load %arg1[%c0_0, %c0_1] : memref<128x128xbf16, #tpu.memory_space<vmem>>, vector<128x128xbf16>
    "tpu.trace_start"() <{level = 10 : i32, message = "md,nd->mn"}> : () -> ()
    %cst = arith.constant dense<0.000000e+00> : vector<128x128xf32>
    %5 = tpu.matmul %3, %4, %cst {dimension_numbers = #tpu.dot_dimension_numbers<[1], [1], [0], [0], [0, 0, 1, 0], [], []>} : vector<128x128xbf16>, vector<128x128xbf16>, vector<128x128xf32> -> vector<128x128xf32>
    "tpu.trace_stop"() : () -> ()
    %6 = arith.mulf %5, %5 : vector<128x128xf32>
    %cst_2 = arith.constant dense<0.000000e+00> : vector<128xf32>
    %7 = vector.multi_reduction <add>, %6, %cst_2 [1] : vector<128x128xf32> to vector<128xf32>
    %8 = vector.shape_cast %7 : vector<128xf32> to vector<128x1xf32>
    %cst_3 = arith.constant 1.000000e-24 : f32
    %9 = vector.broadcast %cst_3 : f32 to vector<128x1xf32>
    %10 = arith.maximumf %8, %9 : vector<128x1xf32>
    %11 = math.rsqrt %10 : vector<128x1xf32>
    %12 = vector.broadcast %11 : vector<128x1xf32> to vector<128x128xf32>
    %13 = arith.mulf %5, %12 : vector<128x128xf32>
    %14 = arith.truncf %13 : vector<128x128xf32> to vector<128x128xbf16>
    %c0_4 = arith.constant 0 : index
    %c0_5 = arith.constant 0 : index
    %15 = vector.load %arg2[%c0_4, %c0_5] : memref<128x128xbf16, #tpu.memory_space<vmem>>, vector<128x128xbf16>
    tpu.vector_store %arg2[%c0_4, %c0_5], %14 {strides = array<i32>} : memref<128x128xbf16, #tpu.memory_space<vmem>>, vector<128x128xbf16>,
    return
  }
  func.func @transform_0(%arg0: i32) -> (i32, i32) {
    %c0_i32 = arith.constant 0 : i32
    %c0_i32_0 = arith.constant 0 : i32
    %c0_i32_1 = arith.constant 0 : i32
    return %c0_i32, %c0_i32_0 : i32, i32
  }
  func.func @transform_1(%arg0: i32) -> (i32, i32) {
    %c0_i32 = arith.constant 0 : i32
    %c0_i32_0 = arith.constant 0 : i32
    return %arg0, %c0_i32 : i32, i32
  }
}

module attributes {stable_mosaic.version = 11 : i64} {
  func.func @_l2_normalize_kernel(%arg0: i32, %arg1: memref<128x128xf32, #tpu.memory_space<vmem>>, %arg2: memref<128x128xbf16, #tpu.memory_space<vmem>>) attributes {dimension_semantics = [#tpu.dimension_semantics<parallel>], iteration_bounds = array<i64: 1>, scalar_prefetch = 0 : i64, scratch_operands = 0 : i64, tpu.core_type = #tpu.core_type<tc>, window_params = [{transform_indices = @transform_0, window_bounds = array<i64: 128, 128>}, {transform_indices = @transform_1, window_bounds = array<i64: 128, 128>}]} {
    %c0 = arith.constant 0 : index
    %c0_0 = arith.constant 0 : index
    %0 = vector.load %arg1[%c0, %c0_0] : memref<128x128xf32, #tpu.memory_space<vmem>>, vector<128x128xf32>
    %1 = arith.mulf %0, %0 : vector<128x128xf32>
    %cst = arith.constant dense<0.000000e+00> : vector<128xf32>
    %2 = vector.multi_reduction <add>, %1, %cst [1] : vector<128x128xf32> to vector<128xf32>
    %3 = vector.shape_cast %2 : vector<128xf32> to vector<128x1xf32>
    %cst_1 = arith.constant 1.000000e-24 : f32
    %4 = vector.broadcast %cst_1 : f32 to vector<128x1xf32>
    %5 = arith.maximumf %3, %4 : vector<128x1xf32>
    %6 = math.rsqrt %5 : vector<128x1xf32>
    %7 = vector.broadcast %6 : vector<128x1xf32> to vector<128x128xf32>
    %8 = arith.mulf %0, %7 : vector<128x128xf32>
    %9 = arith.truncf %8 : vector<128x128xf32> to vector<128x128xbf16>
    %c0_2 = arith.constant 0 : index
    %c0_3 = arith.constant 0 : index
    %10 = vector.load %arg2[%c0_2, %c0_3] : memref<128x128xbf16, #tpu.memory_space<vmem>>, vector<128x128xbf16>
    tpu.vector_store %arg2[%c0_2, %c0_3], %9 {strides = array<i32>} : memref<128x128xbf16, #tpu.memory_space<vmem>>, vector<128x128xbf16>,
    return
  }
  func.func @transform_0(%arg0: i32) -> (i32, i32) {
    %c0_i32 = arith.constant 0 : i32
    %c0_i32_0 = arith.constant 0 : i32
    return %arg0, %c0_i32 : i32, i32
  }
  func.func @transform_1(%arg0: i32) -> (i32, i32) {
    %c0_i32 = arith.constant 0 : i32
    %c0_i32_0 = arith.constant 0 : i32
    return %arg0, %c0_i32 : i32, i32
  }
}

module attributes {stable_mosaic.version = 11 : i64} {
  func.func @_ntxent_partial_kernel(%arg0: i32, %arg1: memref<128x128xbf16, #tpu.memory_space<vmem>>, %arg2: memref<128x1xi32, #tpu.memory_space<vmem>>, %arg3: memref<1x128xi32, #tpu.memory_space<vmem>>, %arg4: memref<8x128xf32, #tpu.memory_space<vmem>>) attributes {dimension_semantics = [#tpu.dimension_semantics<parallel>], iteration_bounds = array<i64: 1>, scalar_prefetch = 0 : i64, scratch_operands = 0 : i64, tpu.core_type = #tpu.core_type<tc>, window_params = [{pipeline_mode = #tpu.pipeline_mode<synchronous>, transform_indices = @transform_0, window_bounds = array<i64: 128, 128>}, {pipeline_mode = #tpu.pipeline_mode<synchronous>, transform_indices = @transform_1, window_bounds = array<i64: 128, 1>}, {pipeline_mode = #tpu.pipeline_mode<synchronous>, transform_indices = @transform_2, window_bounds = array<i64: 1, 128>}, {transform_indices = @transform_3, window_bounds = array<i64: 8, 128>}]} {
    %c128_i32 = arith.constant 128 : i32
    %0 = arith.muli %arg0, %c128_i32 : i32
    %1 = tpu.assume_multiple %0, 128 : i32
    %2 = arith.index_cast %1 : i32 to index
    %c0 = arith.constant 0 : index
    %3 = vector.load %arg1[%2, %c0] : memref<128x128xbf16, #tpu.memory_space<vmem>>, vector<128x128xbf16>
    %c0_0 = arith.constant 0 : index
    %c0_1 = arith.constant 0 : index
    %4 = vector.load %arg1[%c0_0, %c0_1] : memref<128x128xbf16, #tpu.memory_space<vmem>>, vector<128x128xbf16>
    "tpu.trace_start"() <{level = 10 : i32, message = "mk,nk->mn"}> : () -> ()
    %cst = arith.constant dense<0.000000e+00> : vector<128x128xf32>
    %5 = tpu.matmul %3, %4, %cst {dimension_numbers = #tpu.dot_dimension_numbers<[1], [1], [0], [0], [0, 0, 1, 0], [], []>} : vector<128x128xbf16>, vector<128x128xbf16>, vector<128x128xf32> -> vector<128x128xf32>
    "tpu.trace_stop"() : () -> ()
    %cst_2 = arith.constant 1.000000e+01 : f32
    %6 = vector.broadcast %cst_2 : f32 to vector<128x128xf32>
    %7 = arith.mulf %5, %6 : vector<128x128xf32>
    %8 = arith.index_cast %1 : i32 to index
    %c0_3 = arith.constant 0 : index
    %9 = vector.load %arg2[%8, %c0_3] : memref<128x1xi32, #tpu.memory_space<vmem>>, vector<128x1xi32>
    %c0_4 = arith.constant 0 : index
    %c0_5 = arith.constant 0 : index
    %10 = vector.load %arg3[%c0_4, %c0_5] : memref<1x128xi32, #tpu.memory_space<vmem>>, vector<1x128xi32>
    %11 = tpu.iota {dimensions = array<i32: 1>} : vector<128x128xi32>
    %12 = tpu.iota {dimensions = array<i32: 0>} : vector<128x128xi32>
    %13 = vector.broadcast %1 : i32 to vector<128x128xi32>
    %14 = arith.addi %13, %12 : vector<128x128xi32>
    %15 = vector.broadcast %9 : vector<128x1xi32> to vector<128x128xi32>
    %16 = vector.broadcast %10 : vector<1x128xi32> to vector<128x128xi32>
    %17 = arith.cmpi eq, %15, %16 : vector<128x128xi32>
    %18 = arith.cmpi ne, %14, %11 : vector<128x128xi32>
    %c16_i32 = arith.constant 16 : i32
    %19 = vector.broadcast %c16_i32 : i32 to vector<128x128xi32>
    %20 = arith.cmpi slt, %14, %19 : vector<128x128xi32>
    %c16_i32_6 = arith.constant 16 : i32
    %21 = vector.broadcast %c16_i32_6 : i32 to vector<128x128xi32>
    %22 = arith.cmpi slt, %11, %21 : vector<128x128xi32>
    %23 = arith.andi %20, %22 : vector<128x128xi1>
    %24 = arith.andi %17, %18 : vector<128x128xi1>
    %25 = arith.andi %24, %23 : vector<128x128xi1>
    %cst_7 = arith.constant dense<true> : vector<128x128xi1>
    %26 = arith.xori %17, %cst_7 : vector<128x128xi1>
    %27 = arith.andi %26, %23 : vector<128x128xi1>
    %cst_8 = arith.constant dense<0xFF800000> : vector<128xf32>
    %28 = vector.multi_reduction <maximumf>, %7, %cst_8 [1] : vector<128x128xf32> to vector<128xf32>
    %29 = vector.shape_cast %28 : vector<128xf32> to vector<128x1xf32>
    %30 = vector.broadcast %29 : vector<128x1xf32> to vector<128x128xf32>
    %31 = arith.subf %7, %30 : vector<128x128xf32>
    %32 = math.exp %31 : vector<128x128xf32>
    %cst_9 = arith.constant 0.000000e+00 : f32
    %33 = vector.broadcast %cst_9 : f32 to vector<128x128xf32>
    %34 = arith.select %27, %32, %33 : vector<128x128xi1>, vector<128x128xf32>
    %cst_10 = arith.constant dense<0.000000e+00> : vector<128xf32>
    %35 = vector.multi_reduction <add>, %34, %cst_10 [1] : vector<128x128xf32> to vector<128xf32>
    %36 = vector.shape_cast %35 : vector<128xf32> to vector<128x1xf32>
    %37 = vector.broadcast %36 : vector<128x1xf32> to vector<128x128xf32>
    %38 = arith.addf %32, %37 : vector<128x128xf32>
    %39 = math.log %38 : vector<128x128xf32>
    %40 = vector.broadcast %29 : vector<128x1xf32> to vector<128x128xf32>
    %41 = arith.subf %7, %40 : vector<128x128xf32>
    %42 = arith.subf %39, %41 : vector<128x128xf32>
    %cst_11 = arith.constant 0.000000e+00 : f32
    %43 = vector.broadcast %cst_11 : f32 to vector<128x128xf32>
    %44 = arith.select %25, %42, %43 : vector<128x128xi1>, vector<128x128xf32>
    %45 = vector.shape_cast %44 : vector<128x128xf32> to vector<1x128x128xf32>
    %cst_12 = arith.constant dense<0.000000e+00> : vector<1xf32>
    %46 = vector.multi_reduction <add>, %45, %cst_12 [1, 2] : vector<1x128x128xf32> to vector<1xf32>
    %47 = vector.shape_cast %46 : vector<1xf32> to vector<1x1x1xf32>
    %48 = vector.extract %47[0, 0, 0] : f32 from vector<1x1x1xf32>
    %49 = arith.extui %25 : vector<128x128xi1> to vector<128x128xi32>
    %50 = arith.sitofp %49 : vector<128x128xi32> to vector<128x128xf32>
    %51 = vector.shape_cast %50 : vector<128x128xf32> to vector<1x128x128xf32>
    %cst_13 = arith.constant dense<0.000000e+00> : vector<1xf32>
    %52 = vector.multi_reduction <add>, %51, %cst_13 [1, 2] : vector<1x128x128xf32> to vector<1xf32>
    %53 = vector.shape_cast %52 : vector<1xf32> to vector<1x1x1xf32>
    %54 = vector.extract %53[0, 0, 0] : f32 from vector<1x1x1xf32>
    %55 = arith.extui %27 : vector<128x128xi1> to vector<128x128xi32>
    %56 = arith.sitofp %55 : vector<128x128xi32> to vector<128x128xf32>
    %57 = vector.shape_cast %56 : vector<128x128xf32> to vector<1x128x128xf32>
    %cst_14 = arith.constant dense<0.000000e+00> : vector<1xf32>
    %58 = vector.multi_reduction <add>, %57, %cst_14 [1, 2] : vector<1x128x128xf32> to vector<1xf32>
    %59 = vector.shape_cast %58 : vector<1xf32> to vector<1x1x1xf32>
    %60 = vector.extract %59[0, 0, 0] : f32 from vector<1x1x1xf32>
    %61 = tpu.iota {dimensions = array<i32: 0>} : vector<8x128xi32>
    %62 = tpu.iota {dimensions = array<i32: 1>} : vector<8x128xi32>
    %c0_i32 = arith.constant 0 : i32
    %63 = vector.broadcast %c0_i32 : i32 to vector<8x128xi32>
    %64 = arith.cmpi eq, %61, %63 : vector<8x128xi32>
    %c0_i32_15 = arith.constant 0 : i32
    %65 = vector.broadcast %c0_i32_15 : i32 to vector<8x128xi32>
    %66 = arith.cmpi eq, %62, %65 : vector<8x128xi32>
    %67 = arith.andi %64, %66 : vector<8x128xi1>
    %cst_16 = arith.constant 0.000000e+00 : f32
    %68 = vector.broadcast %48 : f32 to vector<8x128xf32>
    %69 = vector.broadcast %cst_16 : f32 to vector<8x128xf32>
    %70 = arith.select %67, %68, %69 : vector<8x128xi1>, vector<8x128xf32>
    %c0_i32_17 = arith.constant 0 : i32
    %71 = vector.broadcast %c0_i32_17 : i32 to vector<8x128xi32>
    %72 = arith.cmpi eq, %61, %71 : vector<8x128xi32>
    %c1_i32 = arith.constant 1 : i32
    %73 = vector.broadcast %c1_i32 : i32 to vector<8x128xi32>
    %74 = arith.cmpi eq, %62, %73 : vector<8x128xi32>
    %75 = arith.andi %72, %74 : vector<8x128xi1>
    %cst_18 = arith.constant 0.000000e+00 : f32
    %76 = vector.broadcast %54 : f32 to vector<8x128xf32>
    %77 = vector.broadcast %cst_18 : f32 to vector<8x128xf32>
    %78 = arith.select %75, %76, %77 : vector<8x128xi1>, vector<8x128xf32>
    %79 = arith.addf %70, %78 : vector<8x128xf32>
    %c0_i32_19 = arith.constant 0 : i32
    %80 = vector.broadcast %c0_i32_19 : i32 to vector<8x128xi32>
    %81 = arith.cmpi eq, %61, %80 : vector<8x128xi32>
    %c2_i32 = arith.constant 2 : i32
    %82 = vector.broadcast %c2_i32 : i32 to vector<8x128xi32>
    %83 = arith.cmpi eq, %62, %82 : vector<8x128xi32>
    %84 = arith.andi %81, %83 : vector<8x128xi1>
    %cst_20 = arith.constant 0.000000e+00 : f32
    %85 = vector.broadcast %60 : f32 to vector<8x128xf32>
    %86 = vector.broadcast %cst_20 : f32 to vector<8x128xf32>
    %87 = arith.select %84, %85, %86 : vector<8x128xi1>, vector<8x128xf32>
    %88 = arith.addf %79, %87 : vector<8x128xf32>
    %c0_21 = arith.constant 0 : index
    %c0_22 = arith.constant 0 : index
    %89 = vector.load %arg4[%c0_21, %c0_22] : memref<8x128xf32, #tpu.memory_space<vmem>>, vector<8x128xf32>
    tpu.vector_store %arg4[%c0_21, %c0_22], %88 {strides = array<i32>} : memref<8x128xf32, #tpu.memory_space<vmem>>, vector<8x128xf32>,
    return
  }
  func.func @transform_0(%arg0: i32) -> (i32, i32) {
    %c0_i32 = arith.constant 0 : i32
    %c0_i32_0 = arith.constant 0 : i32
    %c0_i32_1 = arith.constant 0 : i32
    return %c0_i32, %c0_i32_0 : i32, i32
  }
  func.func @transform_1(%arg0: i32) -> (i32, i32) {
    %c0_i32 = arith.constant 0 : i32
    %c0_i32_0 = arith.constant 0 : i32
    %c0_i32_1 = arith.constant 0 : i32
    return %c0_i32, %c0_i32_0 : i32, i32
  }
  func.func @transform_2(%arg0: i32) -> (i32, i32) {
    %c0_i32 = arith.constant 0 : i32
    %c0_i32_0 = arith.constant 0 : i32
    %c0_i32_1 = arith.constant 0 : i32
    return %c0_i32, %c0_i32_0 : i32, i32
  }
  func.func @transform_3(%arg0: i32) -> (i32, i32) {
    %c0_i32 = arith.constant 0 : i32
    %c0_i32_0 = arith.constant 0 : i32
    return %arg0, %c0_i32 : i32, i32
  }
}

</mosaic_0001>

<bundles_post_ra>
// kernel: _lambda_.3
= control target key start
LH: loop header
LB: loop body
LE: loop exit
PB: predicated region body
PF: predicated region fallthrough
CT: control target
= control target key end

     0   :  { %s477_s0 = inlined_call_operand.vmem [shape: f32[128,128], index: 0, kind: input, shape index: {}]   ;;  %s478_s1 = inlined_call_operand.vmem [shape: bf16[128,128], index: 1, kind: output, shape index: {}]  }
   0x1   :  { %v328_v0 = vld [vmem:[%s477_s0 + $0x10] sm:$0xff]  ;;  %v333_v1 = vld [vmem:[%s477_s0] sm:$0xff]  ;;  %v338_v2 = vld [vmem:[%s477_s0 + $0x18] sm:$0xff] }
   0x2   :  { %v26_v3 = vmul.f32 %v328_v0, %v328_v0  ;;  %v24_v4 = vmul.f32 %v333_v1, %v333_v1  ;;  %v347_v5 = vld [vmem:[%s477_s0 + $0x8] sm:$0xff]  ;;  %v27_v6 = vmul.f32 %v338_v2, %v338_v2  ;;  %v361_v9 = vld [vmem:[%s477_s0 + $0x20] sm:$0xff]  ;;  %v370_v12 = vld [vmem:[%s477_s0 + $0x38] sm:$0xff] }
   0x3   :  { %v25_v7 = vmul.f32 %v347_v5, %v347_v5  ;;  %v356_v8 = vld [vmem:[%s477_s0 + $0x28] sm:$0xff]  ;;  %v28_v11 = vmul.f32 %v361_v9, %v361_v9  ;;  %v375_v13 = vld [vmem:[%s477_s0 + $0x30] sm:$0xff]  ;;  %v31_v14 = vmul.f32 %v370_v12, %v370_v12  ;;  %v389_v17 = vld [vmem:[%s477_s0 + $0x40] sm:$0xff] }
   0x4   :  { %44 = vadd.xlane.f32.xlu1 %v26_v3  ;;  %40 = vadd.xlane.f32.xlu0 %v24_v4  ;;  %v29_v10 = vmul.f32 %v356_v8, %v356_v8  ;;  %v30_v15 = vmul.f32 %v375_v13, %v375_v13  ;;  %v384_v16 = vld [vmem:[%s477_s0 + $0x48] sm:$0xff]  ;;  %v32_v19 = vmul.f32 %v389_v17, %v389_v17  ;;  %v398_v20 = vld [vmem:[%s477_s0 + $0x58] sm:$0xff]  ;;  %v403_v21 = vld [vmem:[%s477_s0 + $0x50] sm:$0xff] }
   0x5   :  { %v33_v18 = vmul.f32 %v384_v16, %v384_v16  ;;  %v35_v22 = vmul.f32 %v398_v20, %v398_v20  ;;  %v34_v23 = vmul.f32 %v403_v21, %v403_v21  ;;  %v412_v24 = vld [vmem:[%s477_s0 + $0x68] sm:$0xff]  ;;  %v417_v25 = vld [vmem:[%s477_s0 + $0x60] sm:$0xff]  ;;  %v426_v28 = vld [vmem:[%s477_s0 + $0x78] sm:$0xff] }
   0x6   :  { %v37_v26 = vmul.f32 %v412_v24, %v412_v24  ;;  %v36_v27 = vmul.f32 %v417_v25, %v417_v25  ;;  %v431_v29 = vld [vmem:[%s477_s0 + $0x70] sm:$0xff]  ;;  %v39_v30 = vmul.f32 %v426_v28, %v426_v28 }
   0x7   :  { %v38_v31 = vmul.f32 %v431_v29, %v431_v29 }
   0x8   :  { %46 = vadd.xlane.f32.xlu1 %v27_v6  ;;  %42 = vadd.xlane.f32.xlu0 %v25_v7 }
   0xc   :  { %50 = vadd.xlane.f32.xlu1 %v29_v10  ;;  %48 = vadd.xlane.f32.xlu0 %v28_v11 }
  0x10   :  { %54 = vadd.xlane.f32.xlu1 %v31_v14  ;;  %52 = vadd.xlane.f32.xlu0 %v30_v15 }
  0x14   :  { %58 = vadd.xlane.f32.xlu1 %v33_v18  ;;  %56 = vadd.xlane.f32.xlu0 %v32_v19 }
  0x18   :  { %62 = vadd.xlane.f32.xlu1 %v35_v22  ;;  %60 = vadd.xlane.f32.xlu0 %v34_v23 }
  0x1c   :  { %66 = vadd.xlane.f32.xlu1 %v37_v26  ;;  %64 = vadd.xlane.f32.xlu0 %v36_v27 }
  0x20   :  { %70 = vadd.xlane.f32.xlu1 %v39_v30  ;;  %68 = vadd.xlane.f32.xlu0 %v38_v31 }
  0x8d   :  { %v45_v32 = vpop.xlane.xlu1 %44  ;;  %v41_v33 = vpop.xlane.xlu0 %40 }
  0x8e   :  { %v74_v34 = vmax.f32 %v45_v32, 1e-24  ;;  %v72_v35 = vmax.f32 %v41_v33, 1e-24 }
  0x90   :  { %283 = vrsqrt.f32 %v74_v34 }
  0x91   :  { %v47_v36 = vpop.xlane.xlu1 %46  ;;  %v43_v37 = vpop.xlane.xlu0 %42  ;;  %285 = vrsqrt.f32 %v72_v35 }
  0x92   :  { %v75_v38 = vmax.f32 %v47_v36, 1e-24  ;;  %v73_v39 = vmax.f32 %v43_v37, 1e-24 }
  0x94   :  { %287 = vrsqrt.f32 %v75_v38 }
  0x95   :  { %289 = vrsqrt.f32 %v73_v39  ;;  %v51_v40 = vpop.xlane.xlu1 %50  ;;  %v49_v41 = vpop.xlane.xlu0 %48 }
  0x96   :  { %v77_v42 = vmax.f32 %v51_v40, 1e-24  ;;  %v76_v43 = vmax.f32 %v49_v41, 1e-24 }
  0x98   :  { %291 = vrsqrt.f32 %v77_v42 }
  0x99   :  { %293 = vrsqrt.f32 %v76_v43  ;;  %v55_v44 = vpop.xlane.xlu1 %54  ;;  %v53_v45 = vpop.xlane.xlu0 %52 }
  0x9a   :  { %v79_v46 = vmax.f32 %v55_v44, 1e-24  ;;  %v78_v47 = vmax.f32 %v53_v45, 1e-24 }
  0x9c   :  { %295 = vrsqrt.f32 %v79_v46 }
  0x9d   :  { %297 = vrsqrt.f32 %v78_v47  ;;  %v59_v48 = vpop.xlane.xlu1 %58  ;;  %v57_v49 = vpop.xlane.xlu0 %56 }
  0x9e   :  { %v81_v50 = vmax.f32 %v59_v48, 1e-24  ;;  %v80_v51 = vmax.f32 %v57_v49, 1e-24  ;;  %v284_v52 = vpop.eup %283 }
  0x9f   :  { %v286_v53 = vpop.eup %285  ;;  %v106_v58 = vmul.f32 %v284_v52, %v328_v0 }
  0xa0   :  { %299 = vrsqrt.f32 %v81_v50  ;;  %v104_v62 = vmul.f32 %v286_v53, %v333_v1 }
  0xa1   :  { %v288_v54 = vpop.eup %287  ;;  %301 = vrsqrt.f32 %v80_v51  ;;  %v63_v55 = vpop.xlane.xlu1 %62 }
  0xa2   :  { %v61_v56 = vpop.xlane.xlu0 %60  ;;  %v290_v57 = vpop.eup %289  ;;  %v107_v59 = vmul.f32 %v288_v54, %v338_v2  ;;  %v83_v60 = vmax.f32 %v63_v55, 1e-24 }
  0xa3   :  { %v82_v61 = vmax.f32 %v61_v56, 1e-24  ;;  %v105_v63 = vmul.f32 %v290_v57, %v347_v5 }
  0xa4   :  { %v244_v3 = vpack.c.bf16 %v107_v59, %v106_v58  ;;  %303 = vrsqrt.f32 %v83_v60 }
  0xa5   :  { %v292_v4 = vpop.eup %291  ;;  %v239_v6 = vpack.c.bf16 %v105_v63, %v104_v62  ;;  %305 = vrsqrt.f32 %v82_v61  ;;  %v67_v7 = vpop.xlane.xlu1 %66 }
  0xa6   :  { %v65_v10 = vpop.xlane.xlu0 %64  ;;  %v294_v11 = vpop.eup %293  ;;  %276 = vst [vmem:[%s478_s1 + $0x8] sm:$0xff] %v244_v3   ;;  %v109_v0 = vmul.f32 %v292_v4, %v356_v8  ;;  %v85_v2 = vmax.f32 %v67_v7, 1e-24 }
  0xa7   :  { %v84_v14 = vmax.f32 %v65_v10, 1e-24  ;;  %240 = vst [vmem:[%s478_s1] sm:$0xff] %v239_v6   ;;  %v108_v1 = vmul.f32 %v294_v11, %v361_v9 }
  0xa8   :  { %307 = vrsqrt.f32 %v85_v2 }
  0xa9   :  { %v296_v5 = vpop.eup %295  ;;  %v249_v15 = vpack.c.bf16 %v109_v0, %v108_v1  ;;  %309 = vrsqrt.f32 %v84_v14  ;;  %v71_v18 = vpop.xlane.xlu1 %70 }
  0xaa   :  { %v69_v19 = vpop.xlane.xlu0 %68  ;;  %v298_v22 = vpop.eup %297  ;;  %v111_v23 = vmul.f32 %v296_v5, %v370_v12  ;;  %v87_v26 = vmax.f32 %v71_v18, 1e-24 }
  0xab   :  { %v86_v27 = vmax.f32 %v69_v19, 1e-24  ;;  %277 = vst [vmem:[%s478_s1 + $0x10] sm:$0xff] %v249_v15   ;;  %v110_v8 = vmul.f32 %v298_v22, %v375_v13 }
  0xac   :  { %311 = vrsqrt.f32 %v87_v26 }
  0xad   :  { %v300_v30 = vpop.eup %299  ;;  %v254_v9 = vpack.c.bf16 %v111_v23, %v110_v8  ;;  %313 = vrsqrt.f32 %v86_v27 }
  0xae   :  { %v302_v31 = vpop.eup %301  ;;  %v113_v32 = vmul.f32 %v300_v30, %v384_v16 }
  0xaf   :  { %278 = vst [vmem:[%s478_s1 + $0x18] sm:$0xff] %v254_v9   ;;  %v112_v12 = vmul.f32 %v302_v31, %v389_v17 }
  0xb1   :  { %v304_v33 = vpop.eup %303  ;;  %v259_v34 = vpack.c.bf16 %v113_v32, %v112_v12 }
  0xb2   :  { %v306_v35 = vpop.eup %305  ;;  %v115_v36 = vmul.f32 %v304_v33, %v398_v20 }
  0xb3   :  { %279 = vst [vmem:[%s478_s1 + $0x20] sm:$0xff] %v259_v34   ;;  %v114_v13 = vmul.f32 %v306_v35, %v403_v21 }
  0xb5   :  { %v308_v37 = vpop.eup %307  ;;  %v264_v38 = vpack.c.bf16 %v115_v36, %v114_v13 }
  0xb6   :  { %v310_v16 = vpop.eup %309  ;;  %v117_v39 = vmul.f32 %v308_v37, %v412_v24 }
  0xb7   :  { %280 = vst [vmem:[%s478_s1 + $0x28] sm:$0xff] %v264_v38   ;;  %v116_v17 = vmul.f32 %v310_v16, %v417_v25 }
  0xb9   :  { %v312_v40 = vpop.eup %311  ;;  %v269_v41 = vpack.c.bf16 %v117_v39, %v116_v17 }
  0xba   :  { %v314_v20 = vpop.eup %313  ;;  %v119_v42 = vmul.f32 %v312_v40, %v426_v28 }
  0xbb   :  { %281 = vst [vmem:[%s478_s1 + $0x30] sm:$0xff] %v269_v41   ;;  %v118_v21 = vmul.f32 %v314_v20, %v431_v29 }
  0xbd   :  { %v274_v43 = vpack.c.bf16 %v119_v42, %v118_v21 }
  0xbf   :  { %282 = vst [vmem:[%s478_s1 + $0x38] sm:$0xff] %v274_v43  }

// kernel: _lambda_.4
= control target key start
LH: loop header
LB: loop body
LE: loop exit
PB: predicated region body
PF: predicated region fallthrough
CT: control target
= control target key end

     0   :  { %s790_s0 = inlined_call_operand.vmem [shape: bf16[128,128], index: 0, kind: input, shape index: {}]   ;;  %s791_s1 = inlined_call_operand.vmem [shape: bf16[128,128], index: 1, kind: output, shape index: {}]  }
   0x1   :  { %v580_v0 = vld [vmem:[%s790_s0 + $0x38] sm:$0xff]   ;;  %v581_v1 = vld [vmem:[%s790_s0 + $0x30] sm:$0xff]   ;;  %v582_v2 = vld [vmem:[%s790_s0 + $0x28] sm:$0xff]  }
   0x2   :  { %532 = vmatprep.subr.bf16.mxu0 %v580_v0  ;;  %564 = vmatprep.subr.bf16.mxu1 %v580_v0  ;;  %v588_v3 = vld [vmem:[%s790_s0] sm:$0xff]   ;;  %v584_v6 = vld [vmem:[%s790_s0 + $0x18] sm:$0xff]   ;;  %v585_v7 = vld [vmem:[%s790_s0 + $0x10] sm:$0xff]  }
   0x3   :  { %533 = vmatpush3.bf16.xpose.msra.mxu0 %v580_v0  ;;  %572 = vmatpush3.bf16.xpose.msra.mxu1 %v580_v0  ;;  %v589_v4 = vld [vmem:[%s790_s0 + $0x20] sm:$0xff]   ;;  %v586_v8 = vld [vmem:[%s790_s0 + $0x8] sm:$0xff]   ;;  %v592_v12 = vld [vmem:[%s790_s0 + $0x10] sm:$0xff]  }
   0x4   :  { %534 = vmatprep.subr.bf16.mxu0 %v581_v1  ;;  %565 = vmatprep.subr.bf16.mxu1 %v581_v1  ;;  %v583_v5 = vld [vmem:[%s790_s0 + $0x20] sm:$0xff]   ;;  %v590_v10 = vld [vmem:[%s790_s0 + $0x8] sm:$0xff]   ;;  %v594_v13 = vld [vmem:[%s790_s0 + $0x30] sm:$0xff]  }
   0x5   :  { %548 = vmatprep.mubr.bf16.mxu0 %v588_v3  ;;  %556 = vmatprep.mubr.bf16.mxu1 %v589_v4  ;;  %v587_v9 = vld [vmem:[%s790_s0] sm:$0xff]   ;;  %v591_v11 = vld [vmem:[%s790_s0 + $0x28] sm:$0xff]   ;;  %v593_v14 = vld [vmem:[%s790_s0 + $0x18] sm:$0xff]  }
   0x6   :  { %v595_v15 = vld [vmem:[%s790_s0 + $0x38] sm:$0xff]  }
   0xb   :  { %535 = vmatpush3.bf16.xpose.msra.mxu0 %v581_v1  ;;  %573 = vmatpush3.bf16.xpose.msra.mxu1 %v581_v1 }
   0xc   :  { %536 = vmatprep.subr.bf16.mxu0 %v582_v2  ;;  %566 = vmatprep.subr.bf16.mxu1 %v582_v2 }
  0x13   :  { %537 = vmatpush3.bf16.xpose.msra.mxu0 %v582_v2  ;;  %574 = vmatpush3.bf16.xpose.msra.mxu1 %v582_v2 }
  0x14   :  { %538 = vmatprep.subr.bf16.mxu0 %v583_v5  ;;  %567 = vmatprep.subr.bf16.mxu1 %v583_v5 }
  0x1b   :  { %539 = vmatpush3.bf16.xpose.msra.mxu0 %v583_v5  ;;  %575 = vmatpush3.bf16.xpose.msra.mxu1 %v583_v5 }
  0x1c   :  { %540 = vmatprep.subr.bf16.mxu0 %v584_v6  ;;  %568 = vmatprep.subr.bf16.mxu1 %v584_v6 }
  0x23   :  { %541 = vmatpush3.bf16.xpose.msra.mxu0 %v584_v6  ;;  %576 = vmatpush3.bf16.xpose.msra.mxu1 %v584_v6 }
  0x24   :  { %542 = vmatprep.subr.bf16.mxu0 %v585_v7  ;;  %569 = vmatprep.subr.bf16.mxu1 %v585_v7 }
  0x2b   :  { %543 = vmatpush3.bf16.xpose.msra.mxu0 %v585_v7  ;;  %577 = vmatpush3.bf16.xpose.msra.mxu1 %v585_v7 }
  0x2c   :  { %544 = vmatprep.subr.bf16.mxu0 %v586_v8  ;;  %570 = vmatprep.subr.bf16.mxu1 %v586_v8 }
  0x33   :  { %545 = vmatpush3.bf16.xpose.msra.mxu0 %v586_v8  ;;  %578 = vmatpush3.bf16.xpose.msra.mxu1 %v586_v8 }
  0x34   :  { %546 = vmatprep.subr.bf16.mxu0 %v587_v9  ;;  %571 = vmatprep.subr.bf16.mxu1 %v587_v9 }
  0x3b   :  { %547 = vmatpush3.bf16.xpose.msra.mxu0 %v587_v9  ;;  %579 = vmatpush3.bf16.xpose.msra.mxu1 %v587_v9 }
  0x42   :  { %549 = vmatmul.mubr.bf16.vlgmr.msra.gmra.mxu0 %v590_v10  ;;  %557 = vmatmul.mubr.bf16.vlgmr.msra.gmra.mxu1 %v591_v11 }
  0x43   :  { %552 = vmatprep.mubr.bf16.mxu0 %v592_v12  ;;  %560 = vmatprep.mubr.bf16.mxu1 %v594_v13 }
  0x4a   :  { %553 = vmatmul.mubr.bf16.gmra.mxu0 %v593_v14  ;;  %561 = vmatmul.mubr.bf16.gmra.mxu1 %v595_v15 }
 0x102   :  { %v686_v16 = vpop.f32.mrf.mxu0  ;;  %v688_v17 = vpop.f32.mrf.mxu1 }
 0x103   :  { %v249_v18 = vmul.f32 %v688_v17, %v688_v17  ;;  %v241_v19 = vmul.f32 %v686_v16, %v686_v16 }
 0x104   :  { %v694_v20 = vpop.f32.mrf.mxu0  ;;  %v696_v21 = vpop.f32.mrf.mxu1 }
 0x105   :  { %275 = vadd.xlane.f32.xlu0 %v249_v18  ;;  %259 = vadd.xlane.f32.xlu1 %v241_v19  ;;  %v239_v24 = vmul.f32 %v694_v20, %v694_v20  ;;  %v247_v29 = vmul.f32 %v696_v21, %v696_v21 }
 0x106   :  { %v698_v22 = vpop.f32.mrf.mxu0  ;;  %v700_v23 = vpop.f32.mrf.mxu1 }
 0x107   :  { %v242_v25 = vmul.f32 %v698_v22, %v698_v22  ;;  %v250_v30 = vmul.f32 %v700_v23, %v700_v23 }
 0x108   :  { %v706_v26 = vpop.f32.mrf.mxu0  ;;  %v708_v27 = vpop.f32.mrf.mxu1 }
 0x109   :  { %255 = vadd.xlane.f32.xlu0 %v239_v24  ;;  %261 = vadd.xlane.f32.xlu1 %v242_v25  ;;  %v248_v33 = vmul.f32 %v708_v27, %v708_v27  ;;  %v240_v34 = vmul.f32 %v706_v26, %v706_v26 }
 0x10a   :  { %v710_v28 = vpop.f32.mrf.mxu0  ;;  %v718_v32 = vpop.f32.mrf.mxu1 }
 0x10b   :  { %v245_v37 = vmul.f32 %v710_v28, %v710_v28  ;;  %v253_v46 = vmul.f32 %v718_v32, %v718_v32 }
 0x10c   :  { %v716_v31 = vpop.f32.mrf.mxu0  ;;  %v726_v36 = vpop.f32.mrf.mxu1 }
 0x10d   :  { %271 = vadd.xlane.f32.xlu0 %v247_v29  ;;  %277 = vadd.xlane.f32.xlu1 %v250_v30  ;;  %v243_v42 = vmul.f32 %v716_v31, %v716_v31  ;;  %v251_v45 = vmul.f32 %v726_v36, %v726_v36 }
 0x10e   :  { %v724_v35 = vpop.f32.mrf.mxu0  ;;  %v734_v40 = vpop.f32.mrf.mxu1 }
 0x10f   :  { %v246_v38 = vmul.f32 %v724_v35, %v724_v35  ;;  %v254_v47 = vmul.f32 %v734_v40, %v734_v40 }
 0x110   :  { %v732_v39 = vpop.f32.mrf.mxu0  ;;  %v740_v43 = vpop.f32.mrf.mxu1 }
 0x111   :  { %273 = vadd.xlane.f32.xlu1 %v248_v33  ;;  %257 = vadd.xlane.f32.xlu0 %v240_v34  ;;  %v244_v41 = vmul.f32 %v732_v39, %v732_v39  ;;  %v252_v44 = vmul.f32 %v740_v43, %v740_v43 }
 0x115   :  { %267 = vadd.xlane.f32.xlu0 %v245_v37  ;;  %269 = vadd.xlane.f32.xlu1 %v246_v38 }
 0x119   :  { %263 = vadd.xlane.f32.xlu0 %v243_v42  ;;  %265 = vadd.xlane.f32.xlu1 %v244_v41 }
 0x11d   :  { %279 = vadd.xlane.f32.xlu0 %v251_v45  ;;  %281 = vadd.xlane.f32.xlu1 %v252_v44 }
 0x121   :  { %283 = vadd.xlane.f32.xlu0 %v253_v46  ;;  %285 = vadd.xlane.f32.xlu1 %v254_v47 }
 0x18e   :  { %v276_v48 = vpop.xlane.xlu0 %275  ;;  %v260_v49 = vpop.xlane.xlu1 %259 }
 0x18f   :  { %v289_v50 = vmax.f32 %v260_v49, 1e-24  ;;  %v297_v54 = vmax.f32 %v276_v48, 1e-24 }
 0x191   :  { %596 = vrsqrt.f32 %v289_v50 }
 0x192   :  { %v256_v51 = vpop.xlane.xlu0 %255  ;;  %v262_v52 = vpop.xlane.xlu1 %261 }
 0x193   :  { %v290_v53 = vmax.f32 %v262_v52, 1e-24  ;;  %v287_v59 = vmax.f32 %v256_v51, 1e-24 }
 0x195   :  { %598 = vrsqrt.f32 %v290_v53 }
 0x196   :  { %v272_v55 = vpop.xlane.xlu0 %271  ;;  %v278_v56 = vpop.xlane.xlu1 %277  ;;  %600 = vrsqrt.f32 %v297_v54 }
 0x197   :  { %v295_v57 = vmax.f32 %v272_v55, 1e-24  ;;  %v298_v58 = vmax.f32 %v278_v56, 1e-24 }
 0x199   :  { %602 = vrsqrt.f32 %v298_v58 }
 0x19a   :  { %v274_v60 = vpop.xlane.xlu1 %273  ;;  %v258_v61 = vpop.xlane.xlu0 %257  ;;  %604 = vrsqrt.f32 %v295_v57 }
 0x19b   :  { %v296_v62 = vmax.f32 %v274_v60, 1e-24  ;;  %v288_v63 = vmax.f32 %v258_v61, 1e-24  ;;  %606 = vrsqrt.f32 %v287_v59 }
 0x19d   :  { %608 = vrsqrt.f32 %v296_v62 }
 0x19e   :  { %610 = vrsqrt.f32 %v288_v63  ;;  %v268_v0 = vpop.xlane.xlu0 %267  ;;  %v270_v1 = vpop.xlane.xlu1 %269 }
 0x19f   :  { %v293_v2 = vmax.f32 %v268_v0, 1e-24  ;;  %v294_v3 = vmax.f32 %v270_v1, 1e-24  ;;  %v597_v4 = vpop.eup %596 }
 0x1a0   :  { %v321_v10 = vmul.f32 %v597_v4, %v686_v16 }
 0x1a1   :  { %612 = vrsqrt.f32 %v293_v2 }
 0x1a2   :  { %614 = vrsqrt.f32 %v294_v3  ;;  %v264_v5 = vpop.xlane.xlu0 %263  ;;  %v266_v6 = vpop.xlane.xlu1 %265 }
 0x1a3   :  { %v599_v7 = vpop.eup %598  ;;  %v291_v8 = vmax.f32 %v264_v5, 1e-24  ;;  %v292_v9 = vmax.f32 %v266_v6, 1e-24 }
 0x1a4   :  { %v322_v11 = vmul.f32 %v599_v7, %v698_v22  ;;  %v601_v12 = vpop.eup %600 }
 0x1a5   :  { %616 = vrsqrt.f32 %v291_v8  ;;  %v329_v29 = vmul.f32 %v601_v12, %v688_v17 }
 0x1a6   :  { %v477_v13 = vpack.c.bf16 %v322_v11, %v321_v10  ;;  %618 = vrsqrt.f32 %v292_v9  ;;  %v280_v14 = vpop.xlane.xlu0 %279  ;;  %v282_v15 = vpop.xlane.xlu1 %281 }
 0x1a7   :  { %v603_v18 = vpop.eup %602  ;;  %v299_v19 = vmax.f32 %v280_v14, 1e-24  ;;  %v300_v24 = vmax.f32 %v282_v15, 1e-24 }
 0x1a8   :  { %v605_v25 = vpop.eup %604  ;;  %509 = vst [vmem:[%s791_s1 + $0x8] sm:$0xff] %v477_v13   ;;  %v330_v16 = vmul.f32 %v603_v18, %v700_v23 }
 0x1a9   :  { %v607_v30 = vpop.eup %606  ;;  %620 = vrsqrt.f32 %v299_v19  ;;  %v327_v41 = vmul.f32 %v605_v25, %v696_v21 }
 0x1aa   :  { %v609_v22 = vpop.eup %608  ;;  %v497_v33 = vpack.c.bf16 %v330_v16, %v329_v29  ;;  %622 = vrsqrt.f32 %v300_v24  ;;  %v284_v34 = vpop.xlane.xlu0 %283  ;;  %v319_v45 = vmul.f32 %v607_v30, %v694_v20 }
 0x1ab   :  { %v286_v37 = vpop.xlane.xlu1 %285  ;;  %v611_v38 = vpop.eup %610  ;;  %v328_v42 = vmul.f32 %v609_v22, %v708_v27  ;;  %v301_v44 = vmax.f32 %v284_v34, 1e-24 }
 0x1ac   :  { %v302_v17 = vmax.f32 %v286_v37, 1e-24  ;;  %513 = vst [vmem:[%s791_s1 + $0x28] sm:$0xff] %v497_v33   ;;  %v320_v23 = vmul.f32 %v611_v38, %v706_v26 }
 0x1ad   :  { %v492_v46 = vpack.c.bf16 %v328_v42, %v327_v41  ;;  %624 = vrsqrt.f32 %v301_v44 }
 0x1ae   :  { %v613_v47 = vpop.eup %612  ;;  %v472_v48 = vpack.c.bf16 %v320_v23, %v319_v45  ;;  %626 = vrsqrt.f32 %v302_v17 }
 0x1af   :  { %v615_v49 = vpop.eup %614  ;;  %512 = vst [vmem:[%s791_s1 + $0x20] sm:$0xff] %v492_v46   ;;  %v325_v21 = vmul.f32 %v613_v47, %v710_v28 }
 0x1b0   :  { %473 = vst [vmem:[%s791_s1] sm:$0xff] %v472_v48   ;;  %v326_v20 = vmul.f32 %v615_v49, %v724_v35 }
 0x1b2   :  { %v617_v27 = vpop.eup %616  ;;  %v487_v26 = vpack.c.bf16 %v326_v20, %v325_v21 }
 0x1b3   :  { %v619_v50 = vpop.eup %618  ;;  %v323_v51 = vmul.f32 %v617_v27, %v716_v31 }
 0x1b4   :  { %511 = vst [vmem:[%s791_s1 + $0x18] sm:$0xff] %v487_v26   ;;  %v324_v52 = vmul.f32 %v619_v50, %v732_v39 }
 0x1b6   :  { %v621_v53 = vpop.eup %620  ;;  %v482_v54 = vpack.c.bf16 %v324_v52, %v323_v51 }
 0x1b7   :  { %v623_v28 = vpop.eup %622  ;;  %v331_v55 = vmul.f32 %v621_v53, %v726_v36 }
 0x1b8   :  { %510 = vst [vmem:[%s791_s1 + $0x10] sm:$0xff] %v482_v54   ;;  %v332_v35 = vmul.f32 %v623_v28, %v740_v43 }
 0x1ba   :  { %v625_v56 = vpop.eup %624  ;;  %v502_v57 = vpack.c.bf16 %v332_v35, %v331_v55 }
 0x1bb   :  { %v627_v31 = vpop.eup %626  ;;  %v333_v58 = vmul.f32 %v625_v56, %v718_v32 }
 0x1bc   :  { %514 = vst [vmem:[%s791_s1 + $0x30] sm:$0xff] %v502_v57   ;;  %v334_v39 = vmul.f32 %v627_v31, %v734_v40 }
 0x1be   :  { %v507_v59 = vpack.c.bf16 %v334_v39, %v333_v58 }
 0x1c0   :  { %515 = vst [vmem:[%s791_s1 + $0x38] sm:$0xff] %v507_v59  }

// kernel: _lambda_.5
= control target key start
LH: loop header
LB: loop body
LE: loop exit
PB: predicated region body
PF: predicated region fallthrough
CT: control target
= control target key end

     0   :  { %v982_v10 = vmov 0   ;;  %v279_v19 = vlaneseq  ;;  %vm983_vm7 = vmmov 1   ;;  %v984_v37 = vmov 0.0   ;;  %s1122_s0 = inlined_call_operand.vmem [shape: bf16[128,128], index: 0, kind: input, shape index: {}]   ;;  %s1123_s1 = inlined_call_operand.vmem [shape: s32[128,1], index: 1, kind: input, shape index: {}]   ;;  %s1124_s2 = inlined_call_operand.vmem [shape: s32[1,128], index: 2, kind: input, shape index: {}]   ;;  %s1125_s3 = inlined_call_operand.vmem [shape: f32[8,128], index: 3, kind: output, shape index: {}]  }
   0x1   :  { %v958_v0 = vld [vmem:[%s1122_s0 + $0x38] sm:$0xff]   ;;  %v959_v1 = vld [vmem:[%s1122_s0 + $0x30] sm:$0xff]   ;;  %v960_v2 = vld [vmem:[%s1122_s0 + $0x28] sm:$0xff]   ;;  %956 = vset.pattern.permute.xlu1 %v982_v10  ;;  %957 = vset.pattern.permute.xlu0 %v982_v10 }
   0x2   :  { %899 = vmatprep.subr.bf16.mxu0 %v958_v0  ;;  %931 = vmatprep.subr.bf16.mxu1 %v958_v0  ;;  %v966_v3 = vld [vmem:[%s1122_s0] sm:$0xff]   ;;  %v962_v5 = vld [vmem:[%s1122_s0 + $0x18] sm:$0xff]   ;;  %v963_v6 = vld [vmem:[%s1122_s0 + $0x10] sm:$0xff]   ;;  %v1043_v23 = vshrl.u32 %v279_v19, 7  ;;  %v1046_v26 = vand.u32 127, %v279_v19 }
   0x3   :  { %900 = vmatpush3.bf16.xpose.msra.mxu0 %v958_v0  ;;  %939 = vmatpush3.bf16.xpose.msra.mxu1 %v958_v0  ;;  %v961_v4 = vld [vmem:[%s1122_s0 + $0x20] sm:$0xff]   ;;  %v964_v7 = vld [vmem:[%s1122_s0 + $0x8] sm:$0xff]   ;;  %v970_v46 = vld [vmem:[%s1122_s0 + $0x10] sm:$0xff]  }
   0x4   :  { %901 = vmatprep.subr.bf16.mxu0 %v959_v1  ;;  %932 = vmatprep.subr.bf16.mxu1 %v959_v1  ;;  %v965_v8 = vld [vmem:[%s1122_s0] sm:$0xff]   ;;  %v967_v9 = vld [vmem:[%s1122_s0 + $0x8] sm:$0xff]   ;;  %v283_v29 = vadd.s32 8, %v1043_v23  ;;  %vm383_vm0 = vcmp.ne.s32.totalorder %v1043_v23, %v1046_v26  ;;  %vm415_vm4 = vcmp.lt.s32.totalorder %v1046_v26, 16  ;;  %v971_v47 = vld [vmem:[%s1122_s0 + $0x30] sm:$0xff]   ;;  %vm840_vm14 = vcmp.eq.s32.totalorder %v1043_v23, 0 }
   0x5   :  { %915 = vmatprep.mubr.bf16.mxu0 %v966_v3  ;;  %v262_v11 = vld [vmem:[%s1123_s1] sm:$0xff]  ;;  %v263_v12 = vld [vmem:[%s1123_s1 + $0x8] sm:$0xff]  ;;  %v972_v48 = vld [vmem:[%s1122_s0 + $0x18] sm:$0xff]   ;;  %vm841_vm15 = vcmp.eq.s32.totalorder %v1046_v26, 0 }
   0x6   :  { %316 = vperm.xlu1 %956, %v262_v11   ;;  %v878_v28 = vld [vmem:[%s1124_s2] ss:$0 sm:$0xff]  ;;  %vm384_vm2 = vcmp.ne.s32.totalorder %v283_v29, %v1046_v26  ;;  %v969_v45 = vld [vmem:[%s1122_s0 + $0x28] sm:$0xff]   ;;  %v973_v49 = vld [vmem:[%s1122_s0 + $0x38] sm:$0xff]  }
   0x7   :  { %v968_v44 = vld [vmem:[%s1122_s0 + $0x20] sm:$0xff]  }
   0x8   :  { %923 = vmatprep.mubr.bf16.mxu1 %v968_v44 }
   0xa   :  { %319 = vperm.xlu1 %956, %v263_v12  }
   0xb   :  { %902 = vmatpush3.bf16.xpose.msra.mxu0 %v959_v1  ;;  %940 = vmatpush3.bf16.xpose.msra.mxu1 %v959_v1 }
   0xc   :  { %903 = vmatprep.subr.bf16.mxu0 %v960_v2  ;;  %933 = vmatprep.subr.bf16.mxu1 %v960_v2 }
  0x13   :  { %904 = vmatpush3.bf16.xpose.msra.mxu0 %v960_v2  ;;  %941 = vmatpush3.bf16.xpose.msra.mxu1 %v960_v2 }
  0x14   :  { %905 = vmatprep.subr.bf16.mxu0 %v961_v4  ;;  %934 = vmatprep.subr.bf16.mxu1 %v961_v4 }
  0x1b   :  { %906 = vmatpush3.bf16.xpose.msra.mxu0 %v961_v4  ;;  %942 = vmatpush3.bf16.xpose.msra.mxu1 %v961_v4 }
  0x1c   :  { %907 = vmatprep.subr.bf16.mxu0 %v962_v5  ;;  %935 = vmatprep.subr.bf16.mxu1 %v962_v5 }
  0x23   :  { %908 = vmatpush3.bf16.xpose.msra.mxu0 %v962_v5  ;;  %943 = vmatpush3.bf16.xpose.msra.mxu1 %v962_v5 }
  0x24   :  { %909 = vmatprep.subr.bf16.mxu0 %v963_v6  ;;  %936 = vmatprep.subr.bf16.mxu1 %v963_v6 }
  0x2b   :  { %910 = vmatpush3.bf16.xpose.msra.mxu0 %v963_v6  ;;  %944 = vmatpush3.bf16.xpose.msra.mxu1 %v963_v6 }
  0x2c   :  { %911 = vmatprep.subr.bf16.mxu0 %v964_v7  ;;  %937 = vmatprep.subr.bf16.mxu1 %v964_v7 }
  0x33   :  { %912 = vmatpush3.bf16.xpose.msra.mxu0 %v964_v7  ;;  %945 = vmatpush3.bf16.xpose.msra.mxu1 %v964_v7 }
  0x34   :  { %913 = vmatprep.subr.bf16.mxu0 %v965_v8  ;;  %938 = vmatprep.subr.bf16.mxu1 %v965_v8 }
  0x3b   :  { %914 = vmatpush3.bf16.xpose.msra.mxu0 %v965_v8  ;;  %946 = vmatpush3.bf16.xpose.msra.mxu1 %v965_v8 }
  0x42   :  { %916 = vmatmul.mubr.bf16.vlgmr.msra.gmra.mxu0 %v967_v9  ;;  %924 = vmatmul.mubr.bf16.vlgmr.msra.gmra.mxu1 %v969_v45 }
  0x43   :  { %919 = vmatprep.mubr.bf16.mxu0 %v970_v46  ;;  %927 = vmatprep.mubr.bf16.mxu1 %v971_v47 }
  0x4a   :  { %920 = vmatmul.mubr.bf16.gmra.mxu0 %v972_v48  ;;  %928 = vmatmul.mubr.bf16.gmra.mxu1 %v973_v49 }
  0x81   :  { %v317_v21 = vpop.permute.xlu1 %316 }
  0x82   :  { %vm367_vm1 = vcmp.eq.s32.totalorder %v317_v21, %v878_v28 }
  0x83   :  { %vm432_vm5 = vmand %vm367_vm1, %vm383_vm0  ;;  %vm845_vm0 = vcmp.eq.s32.totalorder %v1046_v26, 1 }
  0x84   :  { %vm464_vm8 = vmxor %vm367_vm1, %vm983_vm7 }
  0x85   :  { %v320_v30 = vpop.permute.xlu1 %319  ;;  %vm1058_vm9 = vmand %vm432_vm5, %vm415_vm4 }
  0x86   :  { %vm368_vm3 = vcmp.eq.s32.totalorder %v320_v30, %v878_v28  ;;  %vm1070_vm11 = vmand %vm464_vm8, %vm415_vm4  ;;  %v879_v38 = vsel %vm1058_vm9, 1.0, %v984_v37 }
  0x87   :  { %vm433_vm6 = vmand %vm368_vm3, %vm384_vm2  ;;  %v881_v63 = vsel %vm1070_vm11, 1.0, %v984_v37 }
  0x88   :  { %vm1064_vm10 = vmand %vm433_vm6, %vm415_vm4 }
  0x89   :  { %vm465_vm12 = vmxor %vm368_vm3, %vm983_vm7  ;;  %v880_v39 = vsel %vm1064_vm10, 1.0, %v984_v37  ;;  %vm850_vm3 = vcmp.eq.s32.totalorder %v1046_v26, 2 }
  0x8a   :  { %v760_v41 = vadd.f32 %v880_v39, %v879_v38  ;;  %vm1082_vm13 = vmand %vm465_vm12, %vm415_vm4 }
  0x8b   :  { %v882_v0 = vsel %vm1082_vm13, 1.0, %v984_v37  ;;  %vm842_vm1 = vmand %vm840_vm14, %vm841_vm15 }
  0x8c   :  { %v816_v1 = vadd.f32 %v882_v0, %v881_v63  ;;  %vm846_vm2 = vmand %vm840_vm14, %vm845_vm0 }
  0x8d   :  { %vm851_vm4 = vmand %vm840_vm14, %vm850_vm3 }
 0x102   :  { %v917_v13 = vpop.f32.mrf.mxu0  ;;  %v925_v2 = vpop.f32.mrf.mxu1 }
 0x104   :  { %v182_v14 = vpop.f32.mrf.mxu0  ;;  %v214_v3 = vpop.f32.mrf.mxu1 }
 0x105   :  { %v245_v15 = vmul.f32 10.0, %v182_v14 }
 0x106   :  { %v918_v16 = vpop.f32.mrf.mxu0  ;;  %v926_v4 = vpop.f32.mrf.mxu1 }
 0x107   :  { %496 = vmax.xlane.f32.xlu0 %v245_v15 }
 0x108   :  { %v185_v17 = vpop.f32.mrf.mxu0  ;;  %v217_v5 = vpop.f32.mrf.mxu1 }
 0x109   :  { %v246_v18 = vmul.f32 10.0, %v185_v17 }
 0x10a   :  { %v921_v6 = vpop.f32.mrf.mxu0  ;;  %v929_v7 = vpop.f32.mrf.mxu1 }
 0x10b   :  { %498 = vmax.xlane.f32.xlu0 %v246_v18 }
 0x10c   :  { %v198_v8 = vpop.f32.mrf.mxu0  ;;  %v230_v9 = vpop.f32.mrf.mxu1 }
 0x10e   :  { %v922_v10 = vpop.f32.mrf.mxu0  ;;  %v930_v11 = vpop.f32.mrf.mxu1 }
 0x110   :  { %v201_v12 = vpop.f32.mrf.mxu0  ;;  %v233_v13 = vpop.f32.mrf.mxu1 }
 0x190   :  { %v497_v20 = vpop.xlane.xlu0 %496 }
 0x191   :  { %v1041_v22 = vsub.f32 %v245_v15, %v497_v20 }
 0x193   :  { %v544_v24 = vmul.f32 1.442695, %v1041_v22 }
 0x194   :  { %v499_v25 = vpop.xlane.xlu0 %498 }
 0x195   :  { %974 = vpow2.f32 %v544_v24  ;;  %v529_v27 = vsub.f32 %v246_v18, %v499_v25 }
 0x197   :  { %v546_v31 = vmul.f32 1.442695, %v529_v27 }
 0x199   :  { %976 = vpow2.f32 %v546_v31 }
 0x1a2   :  { %v975_v35 = vpop.eup %974 }
 0x1a3   :  { %v576_v36 = vsel %vm1070_vm11, %v975_v35, 0.0 }
 0x1a4   :  { %592 = vadd.xlane.f32.xlu0 %v576_v36 }
 0x1a6   :  { %v977_v40 = vpop.eup %976 }
 0x1a7   :  { %v577_v43 = vsel %vm1082_vm13, %v977_v40, 0.0 }
 0x1a8   :  { %775 = vadd.xlane.f32.xlu0 %v760_v41  ;;  %594 = vadd.xlane.f32.xlu1 %v577_v43 }
 0x22d   :  { %v593_v50 = vpop.xlane.xlu0 %592 }
 0x22e   :  { %v624_v51 = vadd.f32 %v975_v35, %v593_v50 }
 0x230   :  { %978 = vlog2.f32 %v624_v51 }
 0x231   :  { %v595_v52 = vpop.xlane.xlu1 %594  ;;  %v776_v14 = vpop.xlane.xlu0 %775 }
 0x232   :  { %v625_v53 = vadd.f32 %v977_v40, %v595_v52  ;;  %v777_v15 = vrot.slane %v776_v14, 4 }
 0x234   :  { %980 = vlog2.f32 %v625_v53  ;;  %v778_v16 = vadd.f32 %v777_v15, %v776_v14 }
 0x236   :  { %v779_v17 = vrot.slane %v778_v16, 2 }
 0x23d   :  { %v979_v54 = vpop.eup %978 }
 0x23e   :  { %v641_v55 = vmul.f32 0.6931472, %v979_v54 }
 0x240   :  { %v672_v58 = vsub.f32 %v641_v55, %v1041_v22  ;;  %v780_v22 = vadd.f32 %v779_v17, %v778_v16 }
 0x241   :  { %v981_v56 = vpop.eup %980 }
 0x242   :  { %v643_v57 = vmul.f32 0.6931472, %v981_v56  ;;  %v688_v60 = vsel %vm1058_vm9, %v672_v58, 0.0  ;;  %v781_v29 = vrot.slane %v780_v22, 1 }
 0x244   :  { %v673_v59 = vsub.f32 %v643_v57, %v529_v27  ;;  %v782_v34 = vadd.f32 %v781_v29, %v780_v22 }
 0x246   :  { %v689_v61 = vsel %vm1064_vm10, %v673_v59, 0.0 }
 0x247   :  { %v704_v62 = vadd.f32 %v689_v61, %v688_v60 }
 0x249   :  { %719 = vadd.xlane.f32.xlu0 %v704_v62 }
 0x24d   :  { %831 = vadd.xlane.f32.xlu0 %v816_v1 }
 0x2d2   :  { %v720_v18 = vpop.xlane.xlu0 %719 }
 0x2d3   :  { %v721_v19 = vrot.slane %v720_v18, 4 }
 0x2d5   :  { %v722_v20 = vadd.f32 %v721_v19, %v720_v18 }
 0x2d6   :  { %v832_v21 = vpop.xlane.xlu0 %831 }
 0x2d7   :  { %v723_v24 = vrot.slane %v722_v20, 2  ;;  %v833_v25 = vrot.slane %v832_v21, 4 }
 0x2d9   :  { %v834_v27 = vadd.f32 %v833_v25, %v832_v21  ;;  %v724_v28 = vadd.f32 %v723_v24, %v722_v20 }
 0x2db   :  { %v835_v30 = vrot.slane %v834_v27, 2  ;;  %v725_v31 = vrot.slane %v724_v28, 1 }
 0x2dd   :  { %v836_v32 = vadd.f32 %v835_v30, %v834_v27  ;;  %v726_v33 = vadd.f32 %v725_v31, %v724_v28 }
 0x2df   :  { %947 = vpush %v726_v33  ;;  %v837_v35 = vrot.slane %v836_v32, 1 }
 0x2e0   :  { %949 = vpush %v782_v34 }
 0x2e1   :  { %v838_v36 = vadd.f32 %v837_v35, %v836_v32 }
 0x2e3   :  { %951 = vpush %v838_v36 }
 0x310   :  { %s948_s0 = spop %947 }
 0x311   :  { %v843_v37 = vstv %s948_s0  ;;  %s950_s21 = spop %949 }
 0x312   :  { %v844_v38 = vsel %vm842_vm1, %v843_v37, 0.0  ;;  %v847_v39 = vstv %s950_s21 }
 0x313   :  { %v848_v40 = vsel %vm846_vm2, %v847_v39, 0.0 }
 0x314   :  { %s952_s22 = spop %951  ;;  %v849_v41 = vadd.f32 %v848_v40, %v844_v38 }
 0x315   :  { %v852_v42 = vstv %s952_s22 }
 0x316   :  { %v853_v43 = vsel %vm851_vm4, %v852_v42, 0.0 }
 0x317   :  { %v854_v23 = vadd.f32 %v853_v43, %v849_v41 }
 0x319   :  { %855 = vst [vmem:[%s1125_s3] sm:$0xff] %v854_v23 }

</bundles_post_ra>
